<compile_context>
chip_gen: v5e
topology: v5e:2x2
jax: 0.10.0
libtpu: 0.0.40
codegen_flags: <defaults>
</compile_context>

<pallas_src>
import math

import jax
import jax.numpy as jnp
from jax.experimental import pallas as pl
from jax.experimental.pallas import tpu as pltpu


# ------------------------------ Pallas kernel --------------------------------

def _ffn_kernel(x_ref, w1_ref, b1_ref, w2_ref, b2_ref, o_ref):
    """One (row-tile, d_ff-tile) step of  linear2(relu(linear1(x))).

    x_ref : (tm, d_model)    bf16
    w1_ref: (d_model, tf)    bf16   (chunk of W1^T)
    b1_ref: (1, tf)          f32
    w2_ref: (tf, n_pad)      bf16   (chunk of W2^T, output dim lane-padded)
    b2_ref: (1, n_pad)       f32
    o_ref : (tm, n_pad)      f32    (VMEM-resident accumulator across the f axis)
    """
    f = pl.program_id(1)

    # First visit of this output block: seed the accumulator with the bias.
    @pl.when(f == 0)
    def _init():
        o_ref[...] = jnp.broadcast_to(b2_ref[...], o_ref.shape)

    # First matmul: bf16 MXU inputs, fp32 accumulation; bias + ReLU in fp32.
    h = jnp.dot(x_ref[...], w1_ref[...], preferred_element_type=jnp.float32)
    h = jnp.maximum(h + b1_ref[...], 0.0)

    # Second matmul: this d_ff chunk's contribution, accumulated in fp32 in o_ref.
    o_ref[...] += jnp.dot(h.astype(w2_ref.dtype), w2_ref[...],
                          preferred_element_type=jnp.float32)


# ------------------------------- helpers --------------------------------------

def _round_up(v, m):
    return ((v + m - 1) // m) * m


def _largest_divisor_tile(dim, candidates):
    for c in candidates:
        if c <= dim and dim % c == 0:
            return c
    return dim


def _generation_config():
    """(tm_target, tf_target, vmem_limit_bytes) based on the chip's VMEM size."""
    try:
        vmem_cap = int(pltpu.get_tpu_info().vmem_capacity_bytes)
    except Exception:
        vmem_cap = 64 * 1024 * 1024  # conservative fallback (v7x-sized)
    if vmem_cap >= 96 * 1024 * 1024:      # v5e / v6e: 128 MiB per TensorCore
        return 512, 512, 100 * 1024 * 1024
    else:                                  # v7x (64 MiB per TC) or unknown
        return 256, 256, 52 * 1024 * 1024


def _pick_tm(m, tm_target):
    """Row-tile size: large, multiple of 8 (128 when big), and >=2 tiles when possible."""
    m8 = _round_up(max(m, 1), 8)
    if m8 >= 2 * tm_target:
        return tm_target
    if m8 >= 256:
        # Guarantee at least two MXU-friendly row tiles for megacore sharding.
        return min(tm_target, _round_up((m8 + 1) // 2, 128))
    if m8 >= 16:
        # Tiny inputs: still split so both TensorCores get work.
        return _round_up((m8 + 1) // 2, 8)
    return m8


# --------------------------- one-time weight prep ------------------------------

def prepare_ffn_params(w1_t, b1, w2_t, b2):
    """One-time weight preparation (pad + bf16 cast) — keep OUT of the hot path.

    w1_t = W1.T with shape (d_model, d_ff); w2_t = W2.T with shape (d_ff, d_model).
    """
    d_model, d_ff = w1_t.shape
    n_out = w2_t.shape[1]

    tm_target, tf_target, vmem_limit = _generation_config()

    d_ff_pad = _round_up(d_ff, 128)
    tf = _largest_divisor_tile(d_ff_pad, (tf_target, 384, 256, 128))
    n_pad = _round_up(n_out, 128)

    # Zero-padded hidden units are exactly 0 after relu(x@0 + 0), so they add
    # nothing through the (also zero-padded) W2 rows: semantics preserved.
    w1p = jnp.pad(w1_t, ((0, 0), (0, d_ff_pad - d_ff))).astype(jnp.bfloat16)
    b1p = jnp.pad(b1, (0, d_ff_pad - d_ff)).reshape(1, d_ff_pad).astype(jnp.float32)
    w2p = jnp.pad(w2_t, ((0, d_ff_pad - d_ff), (0, n_pad - n_out))).astype(jnp.bfloat16)
    b2p = jnp.pad(b2, (0, n_pad - n_out)).reshape(1, n_pad).astype(jnp.float32)

    return {
        "w1": w1p, "b1": b1p, "w2": w2p, "b2": b2p,
        "d_model": d_model, "n_out": n_out, "n_pad": n_pad,
        "d_ff_pad": d_ff_pad, "tf": tf,
        "tm_target": tm_target, "vmem_limit": vmem_limit,
    }


# -------------------------------- forward --------------------------------------

def feed_forward(x, params):
    """y = relu(x @ W1^T + b1) @ W2^T + b2, with pre-prepared (padded, bf16) weights."""
    d_model = params["d_model"]
    n_out = params["n_out"]
    n_pad = params["n_pad"]
    d_ff_pad = params["d_ff_pad"]
    tf = params["tf"]

    orig_shape = x.shape
    x2d = x.reshape(-1, d_model)
    m = x2d.shape[0]

    tm = _pick_tm(m, params["tm_target"])
    m_pad = _round_up(m, tm)

    # Only the activation cast/pad stays in the per-call path (cheap vs. weights).
    x_bf = x2d.astype(jnp.bfloat16)
    if m_pad != m:
        x_bf = jnp.pad(x_bf, ((0, m_pad - m), (0, 0)))

    grid = (m_pad // tm, d_ff_pad // tf)

    flops = 2 * m_pad * d_ff_pad * (d_model + n_pad)
    bytes_accessed = (
        m_pad * d_model * 2                                      # x (bf16)
        + grid[0] * (d_model * d_ff_pad + d_ff_pad * n_pad) * 2  # weights re-streamed per M tile
        + d_ff_pad * 4 + n_pad * 4                               # biases
        + m_pad * n_pad * 4                                      # fp32 output
    )

    out = pl.pallas_call(
        _ffn_kernel,
        grid_spec=pltpu.PrefetchScalarGridSpec(
            num_scalar_prefetch=0,
            grid=grid,
            in_specs=[
                pl.BlockSpec((tm, d_model), lambda i, f: (i, 0)),   # x rows
                pl.BlockSpec((d_model, tf), lambda i, f: (0, f)),   # W1^T chunk
                pl.BlockSpec((1, tf),       lambda i, f: (0, f)),   # b1 chunk
                pl.BlockSpec((tf, n_pad),   lambda i, f: (f, 0)),   # W2^T chunk
                pl.BlockSpec((1, n_pad),    lambda i, f: (0, 0)),   # b2
            ],
            out_specs=pl.BlockSpec((tm, n_pad), lambda i, f: (i, 0)),
        ),
        out_shape=jax.ShapeDtypeStruct((m_pad, n_pad), jnp.float32),
        compiler_params=pltpu.CompilerParams(
            dimension_semantics=("parallel", "arbitrary"),
            vmem_limit_bytes=params["vmem_limit"],
        ),
        cost_estimate=pl.CostEstimate(
            flops=flops, transcendentals=0, bytes_accessed=bytes_accessed),
    )(x_bf, params["w1"], params["b1"], params["w2"], params["b2"])
    # NOTE: if profiling on v5e/v6e shows exposed DMA on the W2 chunk, sweep
    # pipeline_mode=pl.Buffered(3) on the W1/W2 BlockSpecs (skip on v7x).

    return out[:m, :n_out].reshape(*orig_shape[:-1], n_out)


# --------------------------------- main ---------------------------------------

if __name__ == "__main__":
    BATCH, SEQ, D_MODEL, D_FF = 2, 8, 32, 64

    key = jax.random.PRNGKey(0)
    kx, kw1, kb1, kw2, kb2 = jax.random.split(key, 5)

    # nn.Linear-style init (uniform(-1/sqrt(fan_in), 1/sqrt(fan_in))); weights
    # are stored directly in the transposed (in, out) layout the kernel wants.
    bound1 = 1.0 / math.sqrt(D_MODEL)
    w1_t = jax.random.uniform(kw1, (D_MODEL, D_FF), jnp.float32, -bound1, bound1)
    b1 = jax.random.uniform(kb1, (D_FF,), jnp.float32, -bound1, bound1)
    bound2 = 1.0 / math.sqrt(D_FF)
    w2_t = jax.random.uniform(kw2, (D_FF, D_MODEL), jnp.float32, -bound2, bound2)
    b2 = jax.random.uniform(kb2, (D_MODEL,), jnp.float32, -bound2, bound2)

    x = jax.random.normal(kx, (BATCH, SEQ, D_MODEL), jnp.float32)

    # One-time weight prep (pad + bf16) outside the hot path.
    params = prepare_ffn_params(w1_t, b1, w2_t, b2)

    ffn = jax.jit(lambda xx: feed_forward(xx, params))
    out = ffn(x)
    jax.block_until_ready(out)

    # fp32 reference (bf16 MXU inputs => small deviation tolerated).
    ref = jnp.maximum(x @ w1_t + b1, 0.0) @ w2_t + b2

    assert out.shape == (BATCH, SEQ, D_MODEL), out.shape
    assert out.dtype == jnp.float32
    assert bool(jnp.all(jnp.isfinite(out)))
    err = float(jnp.max(jnp.abs(out - ref)))
    assert err < 5e-2, f"max abs err {err}"
    print("KERNEL_OK")
</pallas_src>

<mosaic_0001>
module attributes {stable_mosaic.version = 11 : i64} {
  func.func @_ffn_kernel(%arg0: i32, %arg1: i32, %arg2: memref<8x32xbf16, #tpu.memory_space<vmem>>, %arg3: memref<32x128xbf16, #tpu.memory_space<vmem>>, %arg4: memref<1x128xf32, #tpu.memory_space<vmem>>, %arg5: memref<128x128xbf16, #tpu.memory_space<vmem>>, %arg6: memref<1x128xf32, #tpu.memory_space<vmem>>, %arg7: memref<8x128xf32, #tpu.memory_space<vmem>>) attributes {dimension_semantics = [#tpu.dimension_semantics<parallel>, #tpu.dimension_semantics<arbitrary>], iteration_bounds = array<i64: 2, 1>, scalar_prefetch = 0 : i64, scratch_operands = 0 : i64, tpu.core_type = #tpu.core_type<tc>, window_params = [{transform_indices = @transform_0, window_bounds = array<i64: 8, 32>}, {transform_indices = @transform_1, window_bounds = array<i64: 32, 128>}, {transform_indices = @transform_2, window_bounds = array<i64: 1, 128>}, {transform_indices = @transform_3, window_bounds = array<i64: 128, 128>}, {pipeline_mode = #tpu.pipeline_mode<synchronous>, transform_indices = @transform_4, window_bounds = array<i64: 1, 128>}, {transform_indices = @transform_5, window_bounds = array<i64: 8, 128>}]} {
    %c0_i32 = arith.constant 0 : i32
    %0 = arith.cmpi eq, %arg1, %c0_i32 : i32
    %1 = arith.extui %0 : i1 to i32
    %c0_i32_0 = arith.constant 0 : i32
    %2 = arith.cmpi ne, %1, %c0_i32_0 : i32
    scf.if %2 {
      %c0_14 = arith.constant 0 : index
      %c0_15 = arith.constant 0 : index
      %17 = vector.load %arg6[%c0_14, %c0_15] : memref<1x128xf32, #tpu.memory_space<vmem>>, vector<1x128xf32>
      %18 = vector.shape_cast %17 : vector<1x128xf32> to vector<1x128xf32>
      %19 = vector.broadcast %18 : vector<1x128xf32> to vector<8x128xf32>
      %c0_16 = arith.constant 0 : index
      %c0_17 = arith.constant 0 : index
      %20 = vector.load %arg7[%c0_16, %c0_17] : memref<8x128xf32, #tpu.memory_space<vmem>>, vector<8x128xf32>
      tpu.vector_store %arg7[%c0_16, %c0_17], %19 {strides = array<i32>} : memref<8x128xf32, #tpu.memory_space<vmem>>, vector<8x128xf32>,
    } else {
    }
    %c0 = arith.constant 0 : index
    %c0_1 = arith.constant 0 : index
    %3 = vector.load %arg2[%c0, %c0_1] : memref<8x32xbf16, #tpu.memory_space<vmem>>, vector<8x32xbf16>
    %c0_2 = arith.constant 0 : index
    %c0_3 = arith.constant 0 : index
    %4 = vector.load %arg3[%c0_2, %c0_3] : memref<32x128xbf16, #tpu.memory_space<vmem>>, vector<32x128xbf16>
    %cst = arith.constant dense<0.000000e+00> : vector<8x128xf32>
    %5 = tpu.matmul %3, %4, %cst {dimension_numbers = #tpu.dot_dimension_numbers<[1], [0], [0], [1], [0, 0, 1, 1], [], []>} : vector<8x32xbf16>, vector<32x128xbf16>, vector<8x128xf32> -> vector<8x128xf32>
    %c0_4 = arith.constant 0 : index
    %c0_5 = arith.constant 0 : index
    %6 = vector.load %arg4[%c0_4, %c0_5] : memref<1x128xf32, #tpu.memory_space<vmem>>, vector<1x128xf32>
    %7 = vector.broadcast %6 : vector<1x128xf32> to vector<8x128xf32>
    %8 = arith.addf %5, %7 : vector<8x128xf32>
    %cst_6 = arith.constant 0.000000e+00 : f32
    %9 = vector.broadcast %cst_6 : f32 to vector<8x128xf32>
    %10 = arith.maximumf %8, %9 : vector<8x128xf32>
    %c0_7 = arith.constant 0 : index
    %c0_8 = arith.constant 0 : index
    %11 = vector.load %arg7[%c0_7, %c0_8] : memref<8x128xf32, #tpu.memory_space<vmem>>, vector<8x128xf32>
    %12 = arith.truncf %10 : vector<8x128xf32> to vector<8x128xbf16>
    %c0_9 = arith.constant 0 : index
    %c0_10 = arith.constant 0 : index
    %13 = vector.load %arg5[%c0_9, %c0_10] : memref<128x128xbf16, #tpu.memory_space<vmem>>, vector<128x128xbf16>
    %cst_11 = arith.constant dense<0.000000e+00> : vector<8x128xf32>
    %14 = tpu.matmul %12, %13, %cst_11 {dimension_numbers = #tpu.dot_dimension_numbers<[1], [0], [0], [1], [0, 0, 1, 1], [], []>} : vector<8x128xbf16>, vector<128x128xbf16>, vector<8x128xf32> -> vector<8x128xf32>
    %15 = arith.addf %11, %14 : vector<8x128xf32>
    %c0_12 = arith.constant 0 : index
    %c0_13 = arith.constant 0 : index
    %16 = vector.load %arg7[%c0_12, %c0_13] : memref<8x128xf32, #tpu.memory_space<vmem>>, vector<8x128xf32>
    tpu.vector_store %arg7[%c0_12, %c0_13], %15 {strides = array<i32>} : memref<8x128xf32, #tpu.memory_space<vmem>>, vector<8x128xf32>,
    return
  }
  func.func @transform_0(%arg0: i32, %arg1: i32) -> (i32, i32) {
    %c0_i32 = arith.constant 0 : i32
    %c0_i32_0 = arith.constant 0 : i32
    return %arg0, %c0_i32 : i32, i32
  }
  func.func @transform_1(%arg0: i32, %arg1: i32) -> (i32, i32) {
    %c0_i32 = arith.constant 0 : i32
    %c0_i32_0 = arith.constant 0 : i32
    return %c0_i32, %arg1 : i32, i32
  }
  func.func @transform_2(%arg0: i32, %arg1: i32) -> (i32, i32) {
    %c0_i32 = arith.constant 0 : i32
    %c0_i32_0 = arith.constant 0 : i32
    return %c0_i32, %arg1 : i32, i32
  }
  func.func @transform_3(%arg0: i32, %arg1: i32) -> (i32, i32) {
    %c0_i32 = arith.constant 0 : i32
    %c0_i32_0 = arith.constant 0 : i32
    return %arg1, %c0_i32 : i32, i32
  }
  func.func @transform_4(%arg0: i32, %arg1: i32) -> (i32, i32) {
    %c0_i32 = arith.constant 0 : i32
    %c0_i32_0 = arith.constant 0 : i32
    %c0_i32_1 = arith.constant 0 : i32
    return %c0_i32, %c0_i32_0 : i32, i32
  }
  func.func @transform_5(%arg0: i32, %arg1: i32) -> (i32, i32) {
    %c0_i32 = arith.constant 0 : i32
    %c0_i32_0 = arith.constant 0 : i32
    return %arg0, %c0_i32 : i32, i32
  }
}

</mosaic_0001>

<bundles_post_ra>
// kernel: _lambda_.1
= control target key start
LH: loop header
LB: loop body
LE: loop exit
PB: predicated region body
PF: predicated region fallthrough
CT: control target
= control target key end

     0   :  { %10 = vsyncpa [#allocation3], 0  ;;  %s716_s18 = smov 0   ;;  %s718_s19 = smov 0   ;;  %s769_s0 = inlined_call_operand.vmem [shape: bf16[16,32], index: 0, kind: input, shape index: {}]   ;;  %s770_s1 = inlined_call_operand.vmem [shape: bf16[32,128], index: 1, kind: input, shape index: {}]   ;;  %s771_s2 = inlined_call_operand.vmem [shape: f32[1,128], index: 2, kind: input, shape index: {}]   ;;  %s772_s3 = inlined_call_operand.hbm [shape: bf16[128,128], index: 3, kind: input, shape index: {}]   ;;  %s773_s4 = inlined_call_operand.vmem [shape: f32[1,128], index: 4, kind: input, shape index: {}]   ;;  %s774_s5 = inlined_call_operand.vmem [shape: f32[16,128], index: 5, kind: output, shape index: {}]  }
   0x1   :  { %s720_s20 = smov 0  }
   0x2 LB: > { %s522_s21 = sadd.s32 4294967295, %s681_s20   ;;  %s28_s22 = sadd.s32 1, %s677_s19  ;;  %s681_s20 = sphi %s720_s20, %s16_s20   ;;  %s677_s19 = sphi %s718_s19, %s776_s19   ;;  %s673_s18 = sphi %s716_s18, %s775_s18  }
   0x3   : > { %p30_p0 = scmp.ge.s32.totalorder %s28_s22, 2  ;;  %p524_p1 = scmp.ge.s32.totalorder %s681_s20, 1 }
   0x4   : > { %p184_p2 = scmp.lt.s32.totalorder %s681_s20, 3  ;;  %p594_p4 = scmp.eq.s32.totalorder %s522_s21, 0 }
   0x5   : > { %s778_s22 = smov (%p30_p0, %s28_s22), 0  ;;  %s211_s25 = sshll.u32 %s772_s3, 4  ;;  %s212_s25 = int_to_ptr.hbm [resolvable:$true] %s211_s25 }
   0x6   : > { %p185_p3 = pnand %p524_p1, %p184_p2  ;;  %s683_s26 = smov [#allocation2]  }
   0x7   : > { %s213_s27 = sshll.u32 %s683_s26, 4  ;;  %s684_s28 = smov 64   ;;  %s214_s27 = int_to_ptr.vmem [resolvable:$true] %s213_s27 }
   0x8   : > { %p590_p5 = pneg %p185_p3  ;;  %s685_s29 = smov 4  }
   0x9   : > { %239 = sbr.rel (%p185_p3) target bundleno = 289 (0x121), region = 40 }
   0xa   : > { %p591_p6 = pnand %p594_p4, %p590_p5 }
   0xc   : > { %593 = dma.hbm_to_vmem [thread:$0]  (!%p591_p6), %s212_s25, 1024, %s214_s27, [#allocation3], %s684_s28, %s684_s28, %s685_s29  }
   0xe   : > { %668 = dma.done.wait (%p594_p4), [#allocation3], 1024  }
   0xf   : > { %670 = vsyncadd (%p594_p4), [#allocation3], 4294966272  ;;  %p273_p7 = scmp.lt.s32.totalorder %s673_s18, 1  ;;  %v577_v0 = vld [vmem:[%s770_s1 + $0x8] sm:$0xff]  ;;  %v585_v1 = vld [vmem:[#allocation2 + $0x38] sm:$0xff]  ;;  %vm320_vm0 = vcmask 261120  }
  0x10   : > { %330 = vmatpush.bf16.msra.mxu0 %v577_v0  ;;  %v576_v2 = vld [vmem:[%s770_s1] sm:$0xff]  ;;  %404 = vmatpush.bf16.msra.mxu1 %v585_v1  ;;  %v584_v3 = vld [vmem:[#allocation2 + $0x30] sm:$0xff]  ;;  %v583_v5 = vld [vmem:[#allocation2 + $0x28] sm:$0xff] }
  0x11   : > { %s780_s18 = smov (!%p273_p7, %s673_s18), 1  ;;  %v582_v6 = vld [vmem:[#allocation2 + $0x20] sm:$0xff]  ;;  %v581_v7 = vld [vmem:[#allocation2 + $0x18] sm:$0xff]  ;;  %v580_v8 = vld [vmem:[#allocation2 + $0x10] sm:$0xff] }
  0x12   : > { %s531_s7 = sshll.u32 %s780_s18, 2  ;;  %v579_v9 = vld [vmem:[#allocation2 + $0x8] sm:$0xff]  ;;  %v578_v10 = vld [vmem:[#allocation2] sm:$0xff]  ;;  %s532_s15 = sshll.u32 %s780_s18, 3 }
  0x13   : > { %s276_s12 = scalar_lea.vmem %s769_s0, %s531_s7  ;;  %v623_v11 = vld [vmem:[%s771_s2] ss:$0 sm:$0xff]  ;;  %s288_s24 = scalar_lea.vmem %s774_s5, %s532_s15 }
  0x14   : > { %331 = vmatpush.bf16.msra.mxu0 %v576_v2  ;;  %v299_v4 = vld [vmem:[%s276_s12] sm:$0xf]  ;;  %405 = vmatpush.bf16.msra.mxu1 %v584_v3 }
  0x15   : > { %v624_v17 = vld [vmem:[%s773_s4] ss:$0 sm:$0xff] }
  0x17   : > { %541 = vmatmul.msk.bf16.vlgmr.msra.gmra.mxu0 %vm320_vm0, %v299_v4 }
  0x18   : > { %406 = vmatpush.bf16.msra.mxu1 %v583_v5 }
  0x1c   : > { %407 = vmatpush.bf16.msra.mxu1 %v582_v6 }
  0x20   : > { %408 = vmatpush.bf16.msra.mxu1 %v581_v7 }
  0x24   : > { %409 = vmatpush.bf16.msra.mxu1 %v580_v8 }
  0x28   : > { %410 = vmatpush.bf16.msra.mxu1 %v579_v9 }
  0x2c   : > { %411 = vmatpush.bf16.msra.mxu1 %v578_v10 }
  0x94   : > { %v333_v12 = vpop.f32.mrf.mxu0 }
  0x95   : > { %v334_v13 = vadd.f32 %v623_v11, %v333_v12 }
  0x97   : > { %v337_v14 = vmax.f32 %v334_v13, 0.0 }
  0x99   : > { %v339_v15 = vpack.c.bf16 %v337_v14, %v337_v14 }
  0x9b   : > { %412 = vmatmul.bf16.vlgmr.msra.gmra.mxu1 %v339_v15 }
  0x9c   : > { %v335_v16 = vpop.f32.mrf.mxu0 }
 0x118   : > { %v413_v18 = vpop.f32.mrf.mxu1 }
 0x119   : > { %v417_v19 = vadd.f32 %v624_v17, %v413_v18 }
 0x11b   : > { %418 = vst [vmem:[%s288_s24] sm:$0xff] %v417_v19 }
 0x120   : > { %v415_v20 = vpop.f32.mrf.mxu1 }
 0x121 PF: > { %s16_s20 = sadd.s32 1, %s681_s20   ;;  %s775_s18 = smov %s677_s19 }
 0x122   : > { %p13_p8 = scmp.ge.s32.totalorder %s16_s20, 4   ;;  %s776_s19 = smov %s778_s22 }
 0x124   :  { %15 = sbr.rel (!%p13_p8) target bundleno = 2 (0x2), region = 86 }
 0x129   :  { %438 = vsyncpa [#allocation3], 1 }
 0x12a   :  { %440 = vsyncpa [#allocation3 + $0x1], 1 }

</bundles_post_ra>
